<compile_context>
chip_gen: v6e
topology: v6e:2x2x1
jax: 0.10.0
libtpu: 0.0.40
codegen_flags: <defaults>
</compile_context>

<pallas_src>
import jax
import jax.numpy as jnp
from jax import lax
from jax.experimental import pallas as pl
from jax.experimental.pallas import tpu as pltpu

_T = 0.07
_INV_T = 1.0 / _T


# --------------------------------------------------------------------------- #
# Hardware / tiling helpers
# --------------------------------------------------------------------------- #
def _vmem_capacity_bytes():
    try:
        return int(pltpu.get_tpu_info().vmem_capacity_bytes)
    except Exception:
        return 64 * 1024 * 1024          # v7x per-TC floor -> safe everywhere


def _stage2_footprint_bytes(bn, kp, in_bytes):
    tiles = 2 * 2 * bn * kp * in_bytes   # A + pre.T tiles, double-buffered
    temps = 3 * bn * bn * 4              # s, exp(s - m), select temps (f32)
    small = 16 * bn * 4                  # (1, bn) diag / out / scratch, generous
    return tiles + temps + small


def _pick_block(n128, kp, in_bytes, budget):
    # Largest bn (<= 1024) that divides the 128-padded N, keeps nt >= 2 on the
    # "parallel" i axis (megacore split on v7x), and fits the VMEM budget.
    for bn in (1024, 512, 256, 128):
        if 2 * bn <= n128 and n128 % bn == 0 and \
                _stage2_footprint_bytes(bn, kp, in_bytes) <= budget:
            return bn
    return 128                            # N <= 128 (or very large K): single tile


# --------------------------------------------------------------------------- #
# Stage 1:  A = (log @ C) / t     (temperature folded once, emitted in bf16)
# --------------------------------------------------------------------------- #
def _proj_kernel(log_ref, c_ref, a_ref):
    a = jnp.dot(log_ref[...], c_ref[...], preferred_element_type=jnp.float32)
    a_ref[...] = (a * jnp.float32(_INV_T)).astype(a_ref.dtype)


# --------------------------------------------------------------------------- #
# Stage 2:  per-column  log(sum_j exp(S_ji/t)) - S_ii/t   (online logsumexp)
# --------------------------------------------------------------------------- #
def _make_crcon_kernel(n_real, bn, mask_needed):
    def kernel(a_ref, pt_ref, diag_ref, out_ref, acc_ref, m_ref):
        j = pl.program_id(1)             # row tile (softmax-sum index)  "arbitrary"

        @pl.when(j == 0)
        def _init():
            acc_ref[...] = jnp.zeros_like(acc_ref)
            m_ref[...] = jnp.full_like(m_ref, -jnp.inf)

        # (bn, bn) block of S/t: rows = summation index j, cols = loss index i.
        # pre is pre-transposed (K, N) in the wrapper -> plain ((1,),(0,))
        # contraction, no per-step RHS relayout.  DEFAULT precision, f32 accum.
        s = lax.dot_general(
            a_ref[...], pt_ref[...],
            dimension_numbers=(((1,), (0,)), ((), ())),
            preferred_element_type=jnp.float32,
        )

        if mask_needed:                  # static: only emitted when N was padded
            row = lax.broadcasted_iota(jnp.int32, s.shape, 0) + j * bn
            s = jnp.where(row < n_real, s, -jnp.inf)

        # Online logsumexp over rows (numerically stable; per-block accumulation
        # keeps the column reduction overlapped under the EUP-bound exp stream).
        m_prev = m_ref[...]
        m_new = jnp.maximum(m_prev, jnp.max(s, axis=0, keepdims=True))   # (1, bn)
        acc_ref[...] = acc_ref[...] * jnp.exp(m_prev - m_new) + jnp.sum(
            jnp.exp(s - m_new), axis=0, keepdims=True)
        m_ref[...] = m_new

        @pl.when(j == pl.num_programs(1) - 1)
        def _emit():
            # loss_i = log(sum_j exp(S_ji/t)) - S_ii/t   -- lane-dense (1, bn).
            out_ref[...] = m_ref[...] + jnp.log(acc_ref[...]) - diag_ref[...]

    return kernel


# --------------------------------------------------------------------------- #
# Wrapper
# --------------------------------------------------------------------------- #
def crcon_loss(log, C, pre, *, block_n=None, compute_dtype=jnp.bfloat16):
    """Pallas forward of CRconLoss.forward(log, pre) with parameter C. Scalar f32."""
    log = jnp.asarray(log, jnp.float32)
    C = jnp.asarray(C, jnp.float32)
    pre = jnp.asarray(pre, jnp.float32)

    n, d = log.shape
    d2, k = C.shape
    assert d2 == d and pre.shape == (n, k) and n >= 1

    in_dtype = jnp.float32 if compute_dtype is None else compute_dtype
    in_bytes = jnp.dtype(in_dtype).itemsize

    # ---- Pad K to a multiple of 128 with zero columns (no-op math, full lanes).
    pad_k = (-k) % 128
    if pad_k:
        C = jnp.pad(C, ((0, 0), (0, pad_k)))
        pre = jnp.pad(pre, ((0, 0), (0, pad_k)))
    kp = k + pad_k

    # ---- VMEM budget per generation (64 MiB/TC on v7x, 128 MiB on v5e/v6e).
    cap = _vmem_capacity_bytes()
    vmem_limit = min(int(0.75 * cap), 96 * 1024 * 1024)
    budget = vmem_limit - 8 * 1024 * 1024

    # ---- Pick bn, pad N to a multiple of bn (masked in-kernel).
    n128 = ((n + 127) // 128) * 128
    bn = block_n if block_n is not None else _pick_block(n128, kp, in_bytes, budget)
    assert bn % 128 == 0, "block_n must be a multiple of 128"
    n_pad = ((n + bn - 1) // bn) * bn
    pad_n = n_pad - n
    if pad_n:
        log = jnp.pad(log, ((0, pad_n), (0, 0)))
        pre = jnp.pad(pre, ((0, pad_n), (0, 0)))

    cparams = dict(vmem_limit_bytes=vmem_limit)

    # ---- Stage 1: A = (log @ C) / t, emitted directly in the stage-2 dtype. ----
    a = pl.pallas_call(
        _proj_kernel,
        out_shape=jax.ShapeDtypeStruct((n_pad, kp), in_dtype),
        grid_spec=pltpu.PrefetchScalarGridSpec(
            num_scalar_prefetch=0,
            grid=(n_pad // bn,),
            in_specs=[
                pl.BlockSpec((bn, d), lambda i: (i, 0)),
                pl.BlockSpec((d, kp), lambda i: (0, 0)),
            ],
            out_specs=pl.BlockSpec((bn, kp), lambda i: (i, 0)),
        ),
        compiler_params=pltpu.CompilerParams(
            dimension_semantics=("parallel",), **cparams),
    )(log, C)

    # ---- Diagonal S_ii/t hoisted to the wrapper (O(N*K), f32 accumulation). ----
    diag = jnp.sum(a.astype(jnp.float32) * pre, axis=1).reshape(1, n_pad)

    # ---- Stage-2 inputs: A already in compute dtype; pre transposed once. -----
    pre_t = pre.T.astype(in_dtype)                       # (kp, n_pad)

    nt = n_pad // bn
    cost = pl.CostEstimate(
        flops=2 * n_pad * n_pad * kp,
        transcendentals=n_pad * n_pad,
        bytes_accessed=2 * nt * n_pad * kp * in_bytes + (nt + 1) * n_pad * 4,
    )

    per_col = pl.pallas_call(
        _make_crcon_kernel(n, bn, mask_needed=(pad_n != 0)),
        out_shape=jax.ShapeDtypeStruct((1, n_pad), jnp.float32),
        grid_spec=pltpu.PrefetchScalarGridSpec(
            num_scalar_prefetch=0,
            grid=(nt, nt),                                   # (column tiles, row tiles)
            in_specs=[
                pl.BlockSpec((bn, kp), lambda i, j: (j, 0)),  # A rows    (sum index j)
                pl.BlockSpec((kp, bn), lambda i, j: (0, i)),  # pre.T cols (loss index i)
                pl.BlockSpec((1, bn), lambda i, j: (0, i)),   # diag       (loss index i)
            ],
            out_specs=pl.BlockSpec((1, bn), lambda i, j: (0, i)),
            scratch_shapes=[
                pltpu.VMEM((1, bn), jnp.float32),             # running column sums
                pltpu.VMEM((1, bn), jnp.float32),             # running column max
            ],
        ),
        compiler_params=pltpu.CompilerParams(
            dimension_semantics=("parallel", "arbitrary"), **cparams),
        cost_estimate=cost,
    )(a, pre_t, diag)

    # Mean over the REAL N only (padded columns excluded); tiny O(N) reduce
    # outside the kernel so the per-tile output stores stay lane-dense.
    return jnp.sum(per_col[0, :n]) / jnp.float32(n)


# --------------------------------------------------------------------------- #
# Self-test
# --------------------------------------------------------------------------- #
if __name__ == "__main__":
    key = jax.random.PRNGKey(0)
    k1, k2, k3 = jax.random.split(key, 3)

    # Small shapes consistent with forward(): log (N, D), C (D, K), pre (N, K).
    # N=250 / K=96 are deliberately ragged: exercises K->128 lane padding,
    # N->256 row padding + in-kernel masking, the 2x2 grid (accumulator init,
    # off-diagonal accumulation, final emit) and padded-column exclusion.
    N, D, K = 250, 64, 96
    log = jax.random.normal(k1, (N, D), dtype=jnp.float32) * 0.1
    pre = jax.random.normal(k2, (N, K), dtype=jnp.float32) * 0.1
    C = jax.random.normal(k3, (D, K), dtype=jnp.float32) * 0.1   # module param self.C

    loss = crcon_loss(log, C, pre)
    jax.block_until_ready(loss)

    # Plain-JAX reference mirroring the torch code exactly (small inputs, so the
    # raw exp does not overflow).
    t = jnp.float32(0.07)
    s = jnp.dot(jnp.dot(log, C), pre.T)
    temp = jnp.exp(s / t)
    ref = jnp.mean(-jnp.log(jnp.diag(temp) / jnp.sum(temp, axis=0)))

    assert jnp.allclose(loss, ref, rtol=1e-2, atol=1e-2), (loss, ref)
    print("KERNEL_OK")
</pallas_src>

<mosaic_0001>
module attributes {stable_mosaic.version = 11 : i64} {
  func.func @_proj_kernel(%arg0: i32, %arg1: memref<128x64xf32, #tpu.memory_space<vmem>>, %arg2: memref<64x128xf32, #tpu.memory_space<vmem>>, %arg3: memref<128x128xbf16, #tpu.memory_space<vmem>>) attributes {dimension_semantics = [#tpu.dimension_semantics<parallel>], iteration_bounds = array<i64: 2>, scalar_prefetch = 0 : i64, scratch_operands = 0 : i64, tpu.core_type = #tpu.core_type<tc>, window_params = [{transform_indices = @transform_0, window_bounds = array<i64: 128, 64>}, {pipeline_mode = #tpu.pipeline_mode<synchronous>, transform_indices = @transform_1, window_bounds = array<i64: 64, 128>}, {transform_indices = @transform_2, window_bounds = array<i64: 128, 128>}]} {
    %c0 = arith.constant 0 : index
    %c0_0 = arith.constant 0 : index
    %0 = vector.load %arg1[%c0, %c0_0] : memref<128x64xf32, #tpu.memory_space<vmem>>, vector<128x64xf32>
    %c0_1 = arith.constant 0 : index
    %c0_2 = arith.constant 0 : index
    %1 = vector.load %arg2[%c0_1, %c0_2] : memref<64x128xf32, #tpu.memory_space<vmem>>, vector<64x128xf32>
    %cst = arith.constant dense<0.000000e+00> : vector<128x128xf32>
    %2 = tpu.matmul %0, %1, %cst {dimension_numbers = #tpu.dot_dimension_numbers<[1], [0], [0], [1], [0, 0, 1, 1], [], []>} : vector<128x64xf32>, vector<64x128xf32>, vector<128x128xf32> -> vector<128x128xf32>
    %cst_3 = arith.constant 14.2857141 : f32
    %3 = vector.broadcast %cst_3 : f32 to vector<128x128xf32>
    %4 = arith.mulf %2, %3 : vector<128x128xf32>
    %5 = arith.truncf %4 : vector<128x128xf32> to vector<128x128xbf16>
    %c0_4 = arith.constant 0 : index
    %c0_5 = arith.constant 0 : index
    %6 = vector.load %arg3[%c0_4, %c0_5] : memref<128x128xbf16, #tpu.memory_space<vmem>>, vector<128x128xbf16>
    tpu.vector_store %arg3[%c0_4, %c0_5], %5 {strides = array<i32>} : memref<128x128xbf16, #tpu.memory_space<vmem>>, vector<128x128xbf16>,
    return
  }
  func.func @transform_0(%arg0: i32) -> (i32, i32) {
    %c0_i32 = arith.constant 0 : i32
    %c0_i32_0 = arith.constant 0 : i32
    return %arg0, %c0_i32 : i32, i32
  }
  func.func @transform_1(%arg0: i32) -> (i32, i32) {
    %c0_i32 = arith.constant 0 : i32
    %c0_i32_0 = arith.constant 0 : i32
    %c0_i32_1 = arith.constant 0 : i32
    return %c0_i32, %c0_i32_0 : i32, i32
  }
  func.func @transform_2(%arg0: i32) -> (i32, i32) {
    %c0_i32 = arith.constant 0 : i32
    %c0_i32_0 = arith.constant 0 : i32
    return %arg0, %c0_i32 : i32, i32
  }
}

</mosaic_0001>

<bundles_post_ra>
// kernel: tpu_custom_call.1
= control target key start
LH: loop header
LB: loop body
LE: loop exit
PB: predicated region body
PF: predicated region fallthrough
CT: control target
= control target key end

     0   :  { %7 = vsyncpa [#allocation3], 0  ;;  %s1018_s0 = inlined_call_operand.vmem [shape: f32[256,64], index: 0, kind: input, shape index: {}]   ;;  %s1019_s1 = inlined_call_operand.vmem [shape: f32[64,128], index: 1, kind: input, shape index: {}]   ;;  %s1020_s2 = inlined_call_operand.hbm [shape: bf16[256,128], index: 2, kind: output, shape index: {}]  }
   0x1   :  { %9 = vsyncpa [#allocation3 + $0x1], 0  ;;  %s844_s9 = smov 0   ;;  %s846_s10 = smov 0  }
   0x2   :  { %s848_s11 = smov 0   ;;  %s850_s12 = smov 0  }
   0x3 LB: > { %s865_s13 = sadd.s32 4294967295, %s824_s12   ;;  %s535_s14 = sadd.s32 4294967294, %s824_s12   ;;  %s824_s12 = sphi %s850_s12, %s1026_s12   ;;  %s820_s11 = sphi %s848_s11, %s1025_s11   ;;  %s816_s10 = sphi %s846_s10, %s1024_s10   ;;  %s812_s9 = sphi %s844_s9, %s1023_s9  }
   0x4   : > { %s869_s15 = sadd.s32 1, %s824_s12   ;;  %s69_s16 = sadd.s32 1, %s820_s11 }
   0x5   : > { %s66_s17 = ssub.s32 %s824_s12, %s869_s15  ;;  %p79_p0 = scmp.ne.s32.totalorder %s820_s11, %s816_s10 }
   0x6   : > { %p67_p1 = scmp.eq.s32.totalorder %s66_s17, 0  ;;  %p80_p2 = scmp.eq.s32.totalorder %s865_s13, 1 }
   0x7   : > { %p85_p3 = scmp.ne.s32.totalorder %s816_s10, %s812_s9  ;;  %p86_p4 = scmp.eq.s32.totalorder %s535_s14, 1 }
   0x8   : > { %s880_s18 = scalar_select %p67_p1, %s820_s11, %s69_s16  }
   0x9   : > { %p882_p5 = por %p80_p2, %p79_p0  ;;  %p886_p6 = por %p86_p4, %p85_p3 }
   0xa   : > { %p538_p7 = scmp.ge.s32.totalorder %s824_s12, 1  ;;  %p116_p8 = scmp.lt.s32.totalorder %s824_s12, 3 }
   0xc   : > { %p117_p9 = pnand %p538_p7, %p116_p8 }
   0xd   : > { %s540_s25 = sshll.u32 (!%p117_p9), %s865_s13, 4  ;;  %s135_s23 = sand.u32 (!%p117_p9), 1, %s816_s10  }
   0xe   : > { %120 = sbr.rel (%p117_p9) target bundleno = 262 (0x106), region = 28  ;;  %p139_p10 = scmp.lt.s32.totalorder (!%p117_p9), %s540_s25, 31 }
   0xf   : > { %s539_s24 = sshll.u32 (!%p117_p9), %s135_s23, 6  ;;  %s595_s26 = sshll.u32 (!%p117_p9), %s865_s13, 10 }
  0x10   : > { %s970_s30 = scalar_lea.hbm (!%p117_p9), %s1020_s2, %s595_s26  ;;  %s978_s13 = scalar_lea.sflag (!%p117_p9), [#allocation3], %s135_s23 }
  0x11   : > { %s826_s4 = smov (!%p117_p9), [#allocation2]  }
  0x12   : > { %s768_s5 = sshll.u32 (!%p117_p9), %s826_s4, 4  ;;  %s769_s5 = int_to_ptr.vmem [resolvable:$false] %s768_s5 }
  0x13   : > { %v168_v0 = vld [vmem:[%s1019_s1 + $0x38] sm:$0xff]  ;;  %v167_v1 = vld [vmem:[%s1019_s1 + $0x30] sm:$0xff]  ;;  %v166_v2 = vld [vmem:[%s1019_s1 + $0x28] sm:$0xff]  ;;  %s1028_s25 = smov (!%p139_p10, %s540_s25), 31  ;;  %vm169_vm0 = vcmask 523264  }
  0x14   : > { %667 = vmatprep.subr.mxu0 %v168_v0  ;;  %707 = vmatprep.subr.mxu1 %v168_v0  ;;  %v165_v3 = vld [vmem:[%s1019_s1 + $0x20] sm:$0xff]  ;;  %v164_v4 = vld [vmem:[%s1019_s1 + $0x18] sm:$0xff]  ;;  %v163_v5 = vld [vmem:[%s1019_s1 + $0x10] sm:$0xff]  ;;  %s541_s6 = sshll.u32 %s1028_s25, 3  ;;  %s957_s25 = scalar_lea.vmem [#allocation2], %s539_s24 }
  0x15   : > { %668 = vmatpush3.msra.mxu0 %v168_v0  ;;  %715 = vmatpush3.msra.mxu1 %v168_v0  ;;  %v162_v6 = vld [vmem:[%s1019_s1 + $0x8] sm:$0xff]  ;;  %s917_s17 = scalar_lea.vmem %s1018_s0, %s541_s6  ;;  %v161_v7 = vld [vmem:[%s1019_s1] sm:$0xff]  ;;  %s473_s27 = sshll.u32 %s957_s25, 4  ;;  %s972_s27 = int_to_ptr.vmem [resolvable:$true] %s473_s27 }
  0x16   : > { %669 = vmatprep.subr.mxu0 %v167_v1  ;;  %708 = vmatprep.subr.mxu1 %v167_v1  ;;  %v145_v8 = vld [vmem:[%s917_s17] sm:$0xff]  ;;  %v146_v10 = vld [vmem:[%s917_s17 + $0x8] sm:$0xff]  ;;  %v147_v12 = vld [vmem:[%s917_s17 + $0x10] sm:$0xff]  ;;  %s764_s3 = scalar_lea.vmem %s972_s27, 1024  ;;  %s770_s6 = scalar_lea.vmem %s769_s5, 2048 }
  0x17   : > { %670 = vmatpush3.msra.mxu0 %v167_v1  ;;  %716 = vmatpush3.msra.mxu1 %v167_v1  ;;  %v153_v9 = vld [vmem:[%s917_s17 + $0x40] sm:$0xff]  ;;  %v154_v11 = vld [vmem:[%s917_s17 + $0x48] sm:$0xff]  ;;  %v155_v13 = vld [vmem:[%s917_s17 + $0x50] sm:$0xff]  ;;  %p765_p11 = scmp.ne.s32.totalorder %s972_s27, %s764_s3  ;;  %p771_p0 = scmp.lt.s32.totalorder %s972_s27, %s769_s5 }
  0x18   : > { %671 = vmatprep.subr.mxu0 %v166_v2  ;;  %709 = vmatprep.subr.mxu1 %v166_v2  ;;  %v148_v14 = vld [vmem:[%s917_s17 + $0x18] sm:$0xff]  ;;  %v149_v16 = vld [vmem:[%s917_s17 + $0x20] sm:$0xff]  ;;  %v150_v18 = vld [vmem:[%s917_s17 + $0x28] sm:$0xff]  ;;  %p772_p1 = scmp.lt.s32.totalorder %s770_s6, %s764_s3 }
  0x19   : > { %672 = vmatpush3.msra.mxu0 %v166_v2  ;;  %717 = vmatpush3.msra.mxu1 %v166_v2  ;;  %v156_v15 = vld [vmem:[%s917_s17 + $0x58] sm:$0xff]  ;;  %v157_v17 = vld [vmem:[%s917_s17 + $0x60] sm:$0xff]  ;;  %v158_v19 = vld [vmem:[%s917_s17 + $0x68] sm:$0xff]  ;;  %p766_p12 = pnand %p765_p11, %p882_p5 }
  0x1a   : > { %673 = vmatprep.subr.mxu0 %v165_v3  ;;  %710 = vmatprep.subr.mxu1 %v165_v3  ;;  %v151_v20 = vld [vmem:[%s917_s17 + $0x30] sm:$0xff]  ;;  %v152_v22 = vld [vmem:[%s917_s17 + $0x38] sm:$0xff]  ;;  %p773_p2 = por %p772_p1, %p771_p0 }
  0x1b   : > { %674 = vmatpush3.msra.mxu0 %v165_v3  ;;  %718 = vmatpush3.msra.mxu1 %v165_v3  ;;  %v159_v21 = vld [vmem:[%s917_s17 + $0x70] sm:$0xff]  ;;  %v160_v23 = vld [vmem:[%s917_s17 + $0x78] sm:$0xff]  ;;  %p767_p13 = pneg %p766_p12 }
  0x1c   : > { %675 = vmatprep.subr.mxu0 %v164_v4  ;;  %711 = vmatprep.subr.mxu1 %v164_v4 }
  0x1d   : > { %676 = vmatpush3.msra.mxu0 %v164_v4  ;;  %719 = vmatpush3.msra.mxu1 %v164_v4  ;;  %p774_p3 = pnand %p773_p2, %p767_p13 }
  0x1e   : > { %677 = vmatprep.subr.mxu0 %v163_v5  ;;  %712 = vmatprep.subr.mxu1 %v163_v5 }
  0x1f   : > { %678 = vmatpush3.msra.mxu0 %v163_v5  ;;  %720 = vmatpush3.msra.mxu1 %v163_v5 }
  0x20   : > { %679 = vmatprep.subr.mxu0 %v162_v6  ;;  %713 = vmatprep.subr.mxu1 %v162_v6 }
  0x21   : > { %680 = vmatpush3.msra.mxu0 %v162_v6  ;;  %721 = vmatpush3.msra.mxu1 %v162_v6 }
  0x22   : > { %681 = vmatprep.subr.mxu0 %v161_v7  ;;  %714 = vmatprep.subr.mxu1 %v161_v7 }
  0x23   : > { %682 = vmatpush3.msra.mxu0 %v161_v7  ;;  %722 = vmatpush3.msra.mxu1 %v161_v7 }
  0x24   : > { %683 = vmatprep.mubr.msk.f32.mxu0 %vm169_vm0, %v145_v8  ;;  %695 = vmatprep.mubr.msk.f32.mxu1 %vm169_vm0, %v153_v9 }
  0x25   : > { %684 = vmatmul.mubr.msk.f32.vlgmr.msra.gmra.mxu0 %vm169_vm0, %v146_v10  ;;  %696 = vmatmul.mubr.msk.f32.vlgmr.msra.gmra.mxu1 %vm169_vm0, %v154_v11 }
  0x26   : > { %686 = vmatprep.mubr.msk.f32.mxu0 %vm169_vm0, %v147_v12  ;;  %698 = vmatprep.mubr.msk.f32.mxu1 %vm169_vm0, %v155_v13 }
  0x29   : > { %687 = vmatmul.mubr.msk.f32.gmra.mxu0 %vm169_vm0, %v148_v14  ;;  %699 = vmatmul.mubr.msk.f32.gmra.mxu1 %vm169_vm0, %v156_v15 }
  0x2a   : > { %689 = vmatprep.mubr.msk.f32.mxu0 %vm169_vm0, %v149_v16  ;;  %701 = vmatprep.mubr.msk.f32.mxu1 %vm169_vm0, %v157_v17 }
  0x2d   : > { %690 = vmatmul.mubr.msk.f32.gmra.mxu0 %vm169_vm0, %v150_v18  ;;  %702 = vmatmul.mubr.msk.f32.gmra.mxu1 %vm169_vm0, %v158_v19 }
  0x2e   : > { %692 = vmatprep.mubr.msk.f32.mxu0 %vm169_vm0, %v151_v20  ;;  %704 = vmatprep.mubr.msk.f32.mxu1 %vm169_vm0, %v159_v21 }
  0x31   : > { %693 = vmatmul.mubr.msk.f32.gmra.mxu0 %vm169_vm0, %v152_v22  ;;  %705 = vmatmul.mubr.msk.f32.gmra.mxu1 %vm169_vm0, %v160_v23 }
  0xe5   : > { %v685_v24 = vpop.f32.mrf.mxu0  ;;  %v697_v25 = vpop.f32.mrf.mxu1 }
  0xe6   : > { %v364_v26 = vmul.f32 14.285714, %v685_v24  ;;  %v372_v29 = vmul.f32 14.285714, %v697_v25 }
  0xe7   : > { %v284_v27 = vpop.f32.mrf.mxu0  ;;  %v324_v28 = vpop.f32.mrf.mxu1 }
  0xe8   : > { %v363_v30 = vmul.f32 14.285714, %v284_v27  ;;  %v371_v31 = vmul.f32 14.285714, %v324_v28 }
  0xe9   : > { %v688_v32 = vpop.f32.mrf.mxu0  ;;  %v700_v33 = vpop.f32.mrf.mxu1 }
  0xea   : > { %v599_v34 = vpack.c.bf16 %v364_v26, %v363_v30  ;;  %v619_v35 = vpack.c.bf16 %v372_v29, %v371_v31  ;;  %v366_v36 = vmul.f32 14.285714, %v688_v32  ;;  %v374_v39 = vmul.f32 14.285714, %v700_v33 }
  0xeb   : > { %v294_v37 = vpop.f32.mrf.mxu0  ;;  %v334_v38 = vpop.f32.mrf.mxu1 }
  0xec   : > { %600 = vst [vmem:[%s957_s25] sm:$0xff] %v599_v34   ;;  %639 = vst [vmem:[%s957_s25 + $0x20] sm:$0xff] %v619_v35   ;;  %v365_v40 = vmul.f32 14.285714, %v294_v37  ;;  %v373_v41 = vmul.f32 14.285714, %v334_v38 }
  0xed   : > { %v691_v42 = vpop.f32.mrf.mxu0  ;;  %v703_v43 = vpop.f32.mrf.mxu1 }
  0xee   : > { %v604_v44 = vpack.c.bf16 %v366_v36, %v365_v40  ;;  %v624_v45 = vpack.c.bf16 %v374_v39, %v373_v41  ;;  %v368_v46 = vmul.f32 14.285714, %v691_v42  ;;  %v376_v49 = vmul.f32 14.285714, %v703_v43 }
  0xef   : > { %v304_v47 = vpop.f32.mrf.mxu0  ;;  %v344_v48 = vpop.f32.mrf.mxu1 }
  0xf0   : > { %636 = vst [vmem:[%s957_s25 + $0x8] sm:$0xff] %v604_v44   ;;  %640 = vst [vmem:[%s957_s25 + $0x28] sm:$0xff] %v624_v45   ;;  %v367_v50 = vmul.f32 14.285714, %v304_v47  ;;  %v375_v51 = vmul.f32 14.285714, %v344_v48 }
  0xf1   : > { %v694_v52 = vpop.f32.mrf.mxu0  ;;  %v706_v53 = vpop.f32.mrf.mxu1 }
  0xf2   : > { %v609_v54 = vpack.c.bf16 %v368_v46, %v367_v50  ;;  %v629_v55 = vpack.c.bf16 %v376_v49, %v375_v51  ;;  %v370_v56 = vmul.f32 14.285714, %v694_v52  ;;  %v378_v59 = vmul.f32 14.285714, %v706_v53 }
  0xf3   : > { %v314_v57 = vpop.f32.mrf.mxu0  ;;  %v354_v58 = vpop.f32.mrf.mxu1 }
  0xf4   : > { %637 = vst [vmem:[%s957_s25 + $0x10] sm:$0xff] %v609_v54   ;;  %641 = vst [vmem:[%s957_s25 + $0x30] sm:$0xff] %v629_v55   ;;  %v369_v60 = vmul.f32 14.285714, %v314_v57  ;;  %v377_v61 = vmul.f32 14.285714, %v354_v58 }
  0xf6   : > { %v614_v62 = vpack.c.bf16 %v370_v56, %v369_v60  ;;  %v634_v63 = vpack.c.bf16 %v378_v59, %v377_v61 }
  0xf8   : > { %638 = vst [vmem:[%s957_s25 + $0x18] sm:$0xff] %v614_v62   ;;  %642 = vst [vmem:[%s957_s25 + $0x38] sm:$0xff] %v634_v63  }
  0xf9   : > { %777 = shalt.err (!%p774_p3)
}
  0xfa   : > { %s778_s7 = scalar_lea.hbm %s970_s30, 1024  ;;  %s782_s16 = scalar_lea.hbm %s1020_s2, 2048 }
  0xfb   : > { %p779_p4 = scmp.ne.s32.totalorder %s970_s30, %s778_s7  ;;  %p783_p9 = scmp.lt.s32.totalorder %s970_s30, %s1020_s2 }
  0xfc   : > { %p784_p10 = scmp.lt.s32.totalorder %s782_s16, %s778_s7 }
  0xfd   : > { %p780_p7 = pnand %p779_p4, %p882_p5 }
  0xfe   : > { %p785_p11 = por %p784_p10, %p783_p9 }
  0xff   : > { %p781_p8 = pneg %p780_p7 }
 0x101   : > { %p786_p12 = pnand %p785_p11, %p781_p8 }
 0x103   : > { %789 = shalt.err (!%p786_p12)
}
 0x104   : > { %s827_s22 = smov 64   ;;  %s828_s23 = smov 4  }
 0x105   : > { %723 = dma.vmem_to_hbm [thread:$0]  (%p882_p5), %s972_s27, 1024, %s970_s30, %s978_s13, %s827_s22, %s827_s22, %s828_s23  }
 0x106 PF: > { %p729_p13 = scmp.ge.s32.totalorder %s824_s12, 2  ;;  %s488_s24 = sand.u32 1, %s812_s9  }
 0x107   : > { %s489_s25 = scalar_lea.sflag [#allocation3], %s488_s24 }
 0x108   : > { %p726_p0 = pnand %p729_p13, %p886_p6 }
 0x10a   : > { %p727_p1 = pneg %p726_p0 }
 0x10c   : > { %807 = dma.done.wait (%p727_p1), %s489_s25, 1024  }
 0x10d   : > { %809 = vsyncadd (%p727_p1), %s489_s25, 4294966272  ;;  %p12_p2 = scmp.ge.s32.totalorder %s869_s15, 4   ;;  %s1023_s9 = smov %s816_s10 }
 0x10e   : > { %s1024_s10 = smov %s820_s11  ;;  %s1025_s11 = smov %s880_s18 }
 0x10f   : > { %s1026_s12 = smov %s869_s15  ;;  %14 = sbr.rel (!%p12_p2) target bundleno = 3 (0x3), region = 63 }
 0x114   :  { %494 = vsyncpa [#allocation3], 1 }
 0x115   :  { %496 = vsyncpa [#allocation3 + $0x1], 1 }

</bundles_post_ra>
